<compile_context>
chip_gen: v7x
topology: tpu7x:2x2x1
jax: 0.10.0
libtpu: 0.0.40
codegen_flags: <defaults>
</compile_context>

<pallas_src>
import functools
import math

import jax
import jax.numpy as jnp
import numpy as np
from jax.experimental import pallas as pl
from jax.experimental.pallas import tpu as pltpu

_BN_EPS = 1e-5
_TK_CAP = 4608                       # one K tile for all 3x3x512 layers
_VMEM_LIMIT = 32 * 1024 * 1024       # explicit; safe on v5e/v6e/v7x


def _round_up(x, m):
    return (x + m - 1) // m * m


def _pick_tk(k_dim, cap=_TK_CAP):
    """K tile: lane multiple, <= cap, dividing the padded K exactly."""
    k128 = _round_up(k_dim, 128)
    nk = -(-k128 // cap)                       # ceil
    tk = _round_up(-(-k128 // nk), 128)        # ceil then lane-align
    return tk, nk * tk                         # (tile, padded K)


# ----------------------------------------------------------------------------
# Pallas kernel: tiled bf16 matmul, f32 scratch accumulation, fused epilogue
# (folded-BN affine and/or LeakyReLU(0.1)), bf16 (or f32) store.
# ----------------------------------------------------------------------------
def _mm_kernel(x_ref, w_ref, *rest, leaky, affine):
    if affine:
        s_ref, b_ref, o_ref, acc_ref = rest
    else:
        o_ref, acc_ref = rest

    @pl.when(pl.program_id(2) == 0)
    def _init():
        acc_ref[...] = jnp.zeros_like(acc_ref)

    acc_ref[...] += jnp.dot(x_ref[...], w_ref[...],
                            preferred_element_type=jnp.float32)

    @pl.when(pl.program_id(2) == pl.num_programs(2) - 1)
    def _finish():
        y = acc_ref[...]
        if affine:
            y = y * s_ref[...] + b_ref[...]
        if leaky:
            y = jnp.maximum(y, 0.1 * y)
        o_ref[...] = y.astype(o_ref.dtype)


def fused_matmul(xp, wp, sp=None, bp=None, *, leaky, affine, tm, tn, tk,
                 out_dtype=jnp.bfloat16):
    """out = act((xp @ wp) * sp + bp); xp/wp bf16, f32 accumulation.

    M may be ragged (grid uses pl.cdiv; Pallas masks the last block).
    K and N of xp/wp must already be padded to tk/tn multiples with zeros.
    """
    M, Kp = xp.shape
    _, Np = wp.shape
    in_specs = [pl.BlockSpec((tm, tk), lambda i, j, k: (i, k)),
                pl.BlockSpec((tk, tn), lambda i, j, k: (k, j))]
    args = [xp, wp]
    if affine:
        in_specs += [pl.BlockSpec((1, tn), lambda i, j, k: (0, j)),
                     pl.BlockSpec((1, tn), lambda i, j, k: (0, j))]
        args += [sp, bp]
    return pl.pallas_call(
        functools.partial(_mm_kernel, leaky=leaky, affine=affine),
        out_shape=jax.ShapeDtypeStruct((M, Np), out_dtype),
        grid_spec=pltpu.PrefetchScalarGridSpec(
            num_scalar_prefetch=0,
            grid=(pl.cdiv(M, tm), Np // tn, Kp // tk),
            in_specs=in_specs,
            out_specs=pl.BlockSpec((tm, tn), lambda i, j, k: (i, j)),
            scratch_shapes=[pltpu.VMEM((tm, tn), jnp.float32)]),
        compiler_params=pltpu.CompilerParams(
            dimension_semantics=("parallel", "parallel", "arbitrary"),
            vmem_limit_bytes=_VMEM_LIMIT),
    )(*args)


# ----------------------------------------------------------------------------
# Conv / ConvTranspose built on the Pallas matmul
# ----------------------------------------------------------------------------
def _im2col(x, k, stride, pad, Kp):
    # x: NHWC -> patches (N*Ho*Wo, Kp), column order (kh, kw, C) + zero K-pad.
    x = jnp.pad(x, ((0, 0), (pad, pad), (pad, pad), (0, 0)))
    N, H, W, C = x.shape
    Ho = (H - k) // stride + 1
    Wo = (W - k) // stride + 1
    cols = [x[:, di:di + stride * Ho:stride, dj:dj + stride * Wo:stride, :]
            for di in range(k) for dj in range(k)]
    if Kp > k * k * C:            # fold K zero-padding into the single concat
        cols.append(jnp.zeros((N, Ho, Wo, Kp - k * k * C), x.dtype))
    patches = jnp.concatenate(cols, axis=-1)
    return patches.reshape(N * Ho * Wo, Kp), (N, Ho, Wo)


def _conv_core(x, wmat, sp, bp, cfg, ncols, out_dtype=jnp.bfloat16):
    patches, (N, Ho, Wo) = _im2col(x.astype(jnp.bfloat16), cfg['k'],
                                   cfg['stride'], cfg['pad'], cfg['Kp'])
    M = patches.shape[0]
    # Adaptive tiles; ragged M handled by Pallas masking (no HBM pad copy).
    tm = min(_round_up(M, 16), 512 if M >= 2048 else 256)
    tn = 256 if cfg['Np'] % 256 == 0 else 128
    out = fused_matmul(patches, wmat, sp, bp, leaky=cfg['leaky'],
                       affine=cfg['affine'], tm=tm, tn=tn, tk=cfg['tk'],
                       out_dtype=out_dtype)
    return out[:, :ncols].reshape(N, Ho, Wo, ncols)


def conv2d(x, layer, cfg, out_dtype=jnp.bfloat16):
    return _conv_core(x, layer['w'], layer.get('scale'), layer.get('shift'),
                      cfg, cfg['cout'], out_dtype)


def conv_transpose2d(x, layer, cfg):
    # ConvTranspose2d(4, 2, 1) == 3x3 stride-1 conv over pad-1 input producing
    # the four sub-pixel phases as output-channel groups (one pallas_call),
    # followed by a pixel-shuffle interleave.
    N, H, W, _ = x.shape
    cout = cfg['cout']
    y = _conv_core(x, layer['w'], None, None, cfg, 4 * cout)   # (N,H,W,4*cout)
    y = y.reshape(N, H, W, 2, 2, cout).transpose(0, 1, 3, 2, 4, 5)
    return y.reshape(N, 2 * H, 2 * W, cout)


def crop_like(x, target):
    return x[:, :target.shape[1], :target.shape[2], :]


# ----------------------------------------------------------------------------
# Static layer configuration (pure Python ints -> never traced under jit)
# ----------------------------------------------------------------------------
def _conv_cfg(k, stride, cin, cout, leaky, affine):
    tk, Kp = _pick_tk(k * k * cin)
    return dict(kind='conv', k=k, stride=stride, pad=(k - 1) // 2, cin=cin,
                cout=cout, leaky=leaky, affine=affine, tk=tk, Kp=Kp,
                Np=_round_up(cout, 128))


def _deconv_cfg(cin, cout, leaky):
    tk, Kp = _pick_tk(9 * cin)
    return dict(kind='deconv', k=3, stride=1, pad=1, cin=cin, cout=cout,
                leaky=leaky, affine=False, tk=tk, Kp=Kp,
                Np=_round_up(4 * cout, 128))


def _build_config():
    cfg = {}
    for name, k, s, ci, co in [('conv1', 7, 2, 6, 64), ('conv2', 5, 2, 64, 128),
                               ('conv3', 5, 2, 128, 256), ('conv3_1', 3, 1, 256, 256),
                               ('conv4', 3, 2, 256, 512), ('conv4_1', 3, 1, 512, 512),
                               ('conv5', 3, 2, 512, 512), ('conv5_1', 3, 1, 512, 512),
                               ('conv6', 3, 2, 512, 1024), ('conv6_1', 3, 1, 1024, 1024)]:
        cfg[name] = _conv_cfg(k, s, ci, co, leaky=True, affine=True)
    for name, ci in [('predict_flow6', 1024), ('predict_flow5', 1026),
                     ('predict_flow4', 770), ('predict_flow3', 386),
                     ('predict_flow2', 194)]:
        cfg[name] = _conv_cfg(3, 1, ci, 2, leaky=False, affine=False)
    for name, ci, co in [('deconv5', 1024, 512), ('deconv4', 1026, 256),
                         ('deconv3', 770, 128), ('deconv2', 386, 64)]:
        cfg[name] = _deconv_cfg(ci, co, leaky=True)
    for name in ['upsampled_flow6_to_5', 'upsampled_flow5_to_4',
                 'upsampled_flow4_to_3', 'upsampled_flow3_to_2']:
        cfg[name] = _deconv_cfg(2, 2, leaky=False)
    return cfg


_LAYER_CFG = _build_config()


# ----------------------------------------------------------------------------
# Deterministic parameter construction (kaiming_normal_(w, 0.1), eval-mode BN
# with gamma=1/beta=0/mean=0/var=1 folded to scale/shift).  Weights are stored
# pre-reshaped, pre-padded to tile multiples and pre-cast to bf16.
# ----------------------------------------------------------------------------
def _kaiming(key, k, cin, cout, a=0.1, transpose=False):
    fan_in = (cout if transpose else cin) * k * k
    std = math.sqrt(2.0 / (1.0 + a * a)) / math.sqrt(fan_in)
    return std * jax.random.normal(key, (k, k, cin, cout), jnp.float32)


def _pack_conv_w(w, cfg):
    k, _, cin, cout = w.shape
    wm = np.zeros((cfg['Kp'], cfg['Np']), np.float32)
    wm[:k * k * cin, :cout] = np.asarray(w).reshape(k * k * cin, cout)
    return jnp.asarray(wm, jnp.bfloat16)


def _pack_deconv_w(w, cfg):
    # w: (4,4,cin,cout) laid out (kh,kw,ci,co).  Build the (9*cin, 4*cout)
    # matrix whose column group p = rh*2+rw maps the 3x3 taps of the pad-1
    # input onto output phase (2a+rh, 2b+rw):
    #   y[2a+rh, 2b+rw] = sum_{dh,dw} xpad[a+rh+dh, b+rw+dw] @ W[kh, kw]
    #   with kh = 3-2*dh (rh=0) / 2-2*dh (rh=1), analogously for kw.
    w = np.asarray(w, np.float32)
    cin, cout = w.shape[2], w.shape[3]
    big = np.zeros((3, 3, cin, 2, 2, cout), np.float32)
    for rh in range(2):
        for rw in range(2):
            for dh in range(2):
                for dw in range(2):
                    kh = (3 - 2 * dh) if rh == 0 else (2 - 2 * dh)
                    kw = (3 - 2 * dw) if rw == 0 else (2 - 2 * dw)
                    big[rh + dh, rw + dw, :, rh, rw, :] = w[kh, kw]
    wm = np.zeros((cfg['Kp'], cfg['Np']), np.float32)
    wm[:9 * cin, :4 * cout] = big.reshape(9 * cin, 4 * cout)
    return jnp.asarray(wm, jnp.bfloat16)


def init_params(key):
    bn_scale = 1.0 / math.sqrt(1.0 + _BN_EPS)
    names = list(_LAYER_CFG)
    keys = dict(zip(names, jax.random.split(key, len(names))))
    params = {}
    for name, cfg in _LAYER_CFG.items():
        if cfg['kind'] == 'conv':
            w = _kaiming(keys[name], cfg['k'], cfg['cin'], cfg['cout'])
            entry = {'w': _pack_conv_w(w, cfg)}
            if cfg['affine']:
                entry['scale'] = jnp.full((1, cfg['Np']), bn_scale, jnp.float32)
                entry['shift'] = jnp.zeros((1, cfg['Np']), jnp.float32)
        else:
            w = _kaiming(keys[name], 4, cfg['cin'], cfg['cout'], transpose=True)
            entry = {'w': _pack_deconv_w(w, cfg)}
        params[name] = entry
    return params


# ----------------------------------------------------------------------------
# FlowNetS forward (eval mode: returns flow2)
# ----------------------------------------------------------------------------
def flownets_forward(params, x_nchw):
    x = jnp.transpose(x_nchw, (0, 2, 3, 1)).astype(jnp.bfloat16)  # NCHW->NHWC

    def cv(y, name, **kw):
        return conv2d(y, params[name], _LAYER_CFG[name], **kw)

    def dc(y, name):
        return conv_transpose2d(y, params[name], _LAYER_CFG[name])

    out_conv1 = cv(x, 'conv1')
    out_conv2 = cv(out_conv1, 'conv2')
    out_conv3 = cv(cv(out_conv2, 'conv3'), 'conv3_1')
    out_conv4 = cv(cv(out_conv3, 'conv4'), 'conv4_1')
    out_conv5 = cv(cv(out_conv4, 'conv5'), 'conv5_1')
    out_conv6 = cv(cv(out_conv5, 'conv6'), 'conv6_1')

    flow6 = cv(out_conv6, 'predict_flow6')
    flow6_up = crop_like(dc(flow6, 'upsampled_flow6_to_5'), out_conv5)
    out_deconv5 = crop_like(dc(out_conv6, 'deconv5'), out_conv5)
    concat5 = jnp.concatenate([out_conv5, out_deconv5, flow6_up], axis=-1)

    flow5 = cv(concat5, 'predict_flow5')
    flow5_up = crop_like(dc(flow5, 'upsampled_flow5_to_4'), out_conv4)
    out_deconv4 = crop_like(dc(concat5, 'deconv4'), out_conv4)
    concat4 = jnp.concatenate([out_conv4, out_deconv4, flow5_up], axis=-1)

    flow4 = cv(concat4, 'predict_flow4')
    flow4_up = crop_like(dc(flow4, 'upsampled_flow4_to_3'), out_conv3)
    out_deconv3 = crop_like(dc(concat4, 'deconv3'), out_conv3)
    concat3 = jnp.concatenate([out_conv3, out_deconv3, flow4_up], axis=-1)

    flow3 = cv(concat3, 'predict_flow3')
    flow3_up = crop_like(dc(flow3, 'upsampled_flow3_to_2'), out_conv2)
    out_deconv2 = crop_like(dc(concat3, 'deconv2'), out_conv2)
    concat2 = jnp.concatenate([out_conv2, out_deconv2, flow3_up], axis=-1)

    flow2 = cv(concat2, 'predict_flow2', out_dtype=jnp.float32)
    # TODO(synk): training-mode path (batch-stat BN + returning all five flows)
    # and the batchNorm=False (conv-bias) variant are not implemented.
    return jnp.transpose(flow2, (0, 3, 1, 2))  # back to NCHW


if __name__ == "__main__":
    key = jax.random.PRNGKey(0)
    pkey, xkey, tk1, tk2 = jax.random.split(key, 4)

    # Small self-check of the fused matmul (ragged M, bf16 epilogue, leaky).
    xt = jax.random.normal(tk1, (37, 384), jnp.float32).astype(jnp.bfloat16)
    wt = (0.05 * jax.random.normal(tk2, (384, 128), jnp.float32)).astype(jnp.bfloat16)
    got = fused_matmul(xt, wt, leaky=True, affine=False, tm=16, tn=128, tk=384)
    ref = xt.astype(jnp.float32) @ wt.astype(jnp.float32)
    ref = jnp.maximum(ref, 0.1 * ref)
    assert bool(jnp.allclose(got.astype(jnp.float32), ref, atol=0.05, rtol=0.05))

    params = init_params(pkey)
    # Two stacked RGB frames -> 6 input channels; 64x64 so conv6 reaches 1x1.
    x = jax.random.normal(xkey, (1, 6, 64, 64), jnp.float32)

    flow2 = jax.jit(flownets_forward)(params, x)
    flow2 = jax.block_until_ready(flow2)

    assert flow2.shape == (1, 2, 16, 16), flow2.shape
    assert bool(jnp.all(jnp.isfinite(flow2)))
    print("KERNEL_OK")
</pallas_src>

<mosaic_0001>
module attributes {stable_mosaic.version = 11 : i64} {
  func.func @_mm_kernel(%arg0: i32, %arg1: i32, %arg2: i32, %arg3: memref<16x384xbf16, #tpu.memory_space<vmem>>, %arg4: memref<384x128xbf16, #tpu.memory_space<vmem>>, %arg5: memref<16x128xbf16, #tpu.memory_space<vmem>>, %arg6: memref<16x128xf32, #tpu.memory_space<vmem>>) attributes {dimension_semantics = [#tpu.dimension_semantics<parallel>, #tpu.dimension_semantics<parallel>, #tpu.dimension_semantics<arbitrary>], iteration_bounds = array<i64: 3, 1, 1>, scalar_prefetch = 0 : i64, scratch_operands = 1 : i64, tpu.core_type = #tpu.core_type<tc>, window_params = [{transform_indices = @transform_0, window_bounds = array<i64: 16, 384>}, {transform_indices = @transform_1, window_bounds = array<i64: 384, 128>}, {transform_indices = @transform_2, window_bounds = array<i64: 16, 128>}]} {
    %c0_i32 = arith.constant 0 : i32
    %0 = arith.cmpi eq, %arg2, %c0_i32 : i32
    %1 = arith.extui %0 : i1 to i32
    %c0_i32_0 = arith.constant 0 : i32
    %2 = arith.cmpi ne, %1, %c0_i32_0 : i32
    scf.if %2 {
      %cst_10 = arith.constant 0.000000e+00 : f32
      %12 = vector.broadcast %cst_10 : f32 to vector<16x128xf32>
      %c0_11 = arith.constant 0 : index
      %c0_12 = arith.constant 0 : index
      %13 = vector.load %arg6[%c0_11, %c0_12] : memref<16x128xf32, #tpu.memory_space<vmem>>, vector<16x128xf32>
      tpu.vector_store %arg6[%c0_11, %c0_12], %12 {strides = array<i32>} : memref<16x128xf32, #tpu.memory_space<vmem>>, vector<16x128xf32>,
    } else {
    }
    %c0 = arith.constant 0 : index
    %c0_1 = arith.constant 0 : index
    %3 = vector.load %arg6[%c0, %c0_1] : memref<16x128xf32, #tpu.memory_space<vmem>>, vector<16x128xf32>
    %c0_2 = arith.constant 0 : index
    %c0_3 = arith.constant 0 : index
    %4 = vector.load %arg3[%c0_2, %c0_3] : memref<16x384xbf16, #tpu.memory_space<vmem>>, vector<16x384xbf16>
    %c0_4 = arith.constant 0 : index
    %c0_5 = arith.constant 0 : index
    %5 = vector.load %arg4[%c0_4, %c0_5] : memref<384x128xbf16, #tpu.memory_space<vmem>>, vector<384x128xbf16>
    %cst = arith.constant dense<0.000000e+00> : vector<16x128xf32>
    %6 = tpu.matmul %4, %5, %cst {dimension_numbers = #tpu.dot_dimension_numbers<[1], [0], [0], [1], [0, 0, 1, 1], [], []>} : vector<16x384xbf16>, vector<384x128xbf16>, vector<16x128xf32> -> vector<16x128xf32>
    %7 = arith.addf %3, %6 : vector<16x128xf32>
    %c0_6 = arith.constant 0 : index
    %c0_7 = arith.constant 0 : index
    %8 = vector.load %arg6[%c0_6, %c0_7] : memref<16x128xf32, #tpu.memory_space<vmem>>, vector<16x128xf32>
    tpu.vector_store %arg6[%c0_6, %c0_7], %7 {strides = array<i32>} : memref<16x128xf32, #tpu.memory_space<vmem>>, vector<16x128xf32>,
    %c0_i32_8 = arith.constant 0 : i32
    %9 = arith.cmpi eq, %arg2, %c0_i32_8 : i32
    %10 = arith.extui %9 : i1 to i32
    %c0_i32_9 = arith.constant 0 : i32
    %11 = arith.cmpi ne, %10, %c0_i32_9 : i32
    scf.if %11 {
      %c0_10 = arith.constant 0 : index
      %c0_11 = arith.constant 0 : index
      %12 = vector.load %arg6[%c0_10, %c0_11] : memref<16x128xf32, #tpu.memory_space<vmem>>, vector<16x128xf32>
      %cst_12 = arith.constant 1.000000e-01 : f32
      %13 = vector.broadcast %cst_12 : f32 to vector<16x128xf32>
      %14 = arith.mulf %13, %12 : vector<16x128xf32>
      %15 = arith.maximumf %12, %14 : vector<16x128xf32>
      %16 = arith.truncf %15 : vector<16x128xf32> to vector<16x128xbf16>
      %c0_13 = arith.constant 0 : index
      %c0_14 = arith.constant 0 : index
      %17 = vector.load %arg5[%c0_13, %c0_14] : memref<16x128xbf16, #tpu.memory_space<vmem>>, vector<16x128xbf16>
      tpu.vector_store %arg5[%c0_13, %c0_14], %16 {strides = array<i32>} : memref<16x128xbf16, #tpu.memory_space<vmem>>, vector<16x128xbf16>,
    } else {
    }
    return
  }
  func.func @transform_0(%arg0: i32, %arg1: i32, %arg2: i32) -> (i32, i32) {
    %c0_i32 = arith.constant 0 : i32
    return %arg0, %arg2 : i32, i32
  }
  func.func @transform_1(%arg0: i32, %arg1: i32, %arg2: i32) -> (i32, i32) {
    %c0_i32 = arith.constant 0 : i32
    return %arg2, %arg1 : i32, i32
  }
  func.func @transform_2(%arg0: i32, %arg1: i32, %arg2: i32) -> (i32, i32) {
    %c0_i32 = arith.constant 0 : i32
    return %arg0, %arg1 : i32, i32
  }
}

</mosaic_0001>

<bundles_post_ra>
// kernel: tpu_custom_call.1
= control target key start
LH: loop header
LB: loop body
LE: loop exit
PB: predicated region body
PF: predicated region fallthrough
CT: control target
= control target key end

     0   :  { %7 = vsyncpa [#allocation4], 0  ;;  %s1301_s0 = inlined_call_operand.hbm [shape: bf16[37,384], index: 0, kind: input, shape index: {}]   ;;  %s1302_s1 = inlined_call_operand.hbm [shape: bf16[384,128], index: 1, kind: input, shape index: {}]   ;;  %s1303_s2 = inlined_call_operand.hbm [shape: bf16[37,128], index: 2, kind: output, shape index: {}]  }
   0x1   :  { %9 = vsyncpa [#allocation4 + $0x1], 0 }
   0x2   :  { %10 = vsyncpa [#allocation7], 0 }
   0x3   :  { %11 = vsyncpa [#allocation5], 0 }
   0x4   :  { %13 = vsyncpa [#allocation5 + $0x1], 0  ;;  %s1071_s9 = smov 0   ;;  %s1073_s10 = smov 0  }
   0x5   :  { %s1075_s11 = smov 0   ;;  %s1077_s12 = smov 0  }
   0x6   :  { %s1079_s13 = smov 0   ;;  %s1081_s14 = smov 0  }
   0x7 LB: > { %s684_s15 = sadd.s32 4294967295, %s1043_s14   ;;  %s685_s16 = sadd.s32 4294967294, %s1043_s14   ;;  %s1043_s14 = sphi %s1081_s14, %s19_s14   ;;  %s1039_s13 = sphi %s1079_s13, %s1325_s13   ;;  %s1035_s12 = sphi %s1077_s12, %s1324_s12   ;;  %s1031_s11 = sphi %s1075_s11, %s1323_s11   ;;  %s1027_s10 = sphi %s1073_s10, %s1322_s10   ;;  %s1023_s9 = sphi %s1071_s9, %s1321_s9  }
   0x8   : > { %s38_s17 = sadd.s32 1, %s1039_s13  ;;  %s47_s18 = sadd.s32 1, %s1031_s11 }
   0x9   : > { %p40_p0 = scmp.ge.s32.totalorder %s38_s17, 3  ;;  %p54_p1 = scmp.ne.s32.totalorder %s1031_s11, %s1027_s10 }
   0xa   : > { %p55_p2 = scmp.eq.s32.totalorder %s1043_s14, 0  ;;  %p60_p3 = scmp.ne.s32.totalorder %s1027_s10, %s1023_s9 }
   0xb   : > { %s1327_s17 = smov (%p40_p0, %s38_s17), 0  ;;  %p1116_p5 = scmp.eq.s32.totalorder %s684_s15, 0 }
   0xc   : > { %p1112_p4 = por %p55_p2, %p54_p1  ;;  %s42_s21 = ssub.s32 %s1039_s13, %s1327_s17 }
   0xd   : > { %s1309_s20 = scalar_select %p1116_p5, 1, 0 }
   0xe   : > { %s1308_s19 = scalar_select %p1112_p4, 1, 0 }
   0xf   : > { %p114_p6 = scmp.eq.s32.totalorder %s684_s15, 2  ;;  %p45_p7 = scmp.eq.s32.totalorder %s42_s21, 0 }
  0x10   : > { %p1124_p8 = por %p1116_p5, %p60_p3  ;;  %p120_p10 = scmp.eq.s32.totalorder %s685_s16, 2 }
  0x11   : > { %p1128_p9 = por %p114_p6, %p54_p1  ;;  %p686_p12 = scmp.ge.s32.totalorder %s1043_s14, 1 }
  0x12   : > { %s1310_s22 = scalar_select %p1124_p8, 1, 0 }
  0x13   : > { %s1311_s23 = scalar_select %p1128_p9, 1, 0 }
  0x14   : > { %s1133_s24 = scalar_select %p45_p7, %s1031_s11, %s47_s18  }
  0x15   : > { %p1135_p11 = por %p120_p10, %p60_p3  ;;  %p127_p13 = scmp.lt.s32.totalorder %s1043_s14, 4 }
  0x16   : > { %s1045_s27 = smov [#allocation6]   ;;  %s901_s4 = scalar_lea.hbm %s1302_s1, 3072 }
  0x17   : > { %s1312_s25 = scalar_select %p1135_p11, 1, 0 }
  0x18   : > { %p1141_p0 = pnand %p686_p12, %p127_p13  ;;  %s143_s28 = sshll.u32 %s1045_s27, 4  ;;  %s144_s28 = int_to_ptr.vmem [resolvable:$true] %s143_s28 }
  0x19   : > { %p902_p3 = scmp.ne.s32.totalorder %s1302_s1, %s901_s4  ;;  %p908_p12 = scmp.lt.u32.totalorder %s901_s4, %s1302_s1 }
  0x1a   : > { %s1313_s26 = scalar_select %p1141_p0, 1, 0 }
  0x1b   : > { %p805_p1 = pneg %p1141_p0 }
  0x1d   : > { %p1149_p2 = pnand %p805_p1, %p1116_p5 }
  0x1f   : > { %p903_p6 = pneg %p1149_p2 }
  0x21   : > { %p904_p7 = pnand %p903_p6, %p902_p3 }
  0x23   : > { %p905_p10 = pneg %p904_p7 }
  0x25   : > { %p910_p13 = pnand %p908_p12, %p905_p10 }
  0x27   : > { %913 = shalt.err (!%p910_p13)
}
  0x28   : > { %s914_s15 = scalar_lea.vmem %s144_s28, 3072  ;;  %p922_p5 = scmp.lt.s32.totalorder %s144_s28, %s144_s28 }
  0x29   : > { %p915_p1 = scmp.ne.s32.totalorder %s144_s28, %s914_s15  ;;  %p923_p8 = scmp.lt.s32.totalorder %s914_s15, %s914_s15 }
  0x2b   : > { %p917_p11 = pnand %p915_p1, %p903_p6  ;;  %p924_p0 = por %p923_p8, %p922_p5 }
  0x2d   : > { %p918_p9 = pneg %p917_p11 }
  0x2f   : > { %p925_p4 = pnand %p924_p0, %p918_p9 }
  0x31   : > { %928 = shalt.err (!%p925_p4)
}
  0x32   : > { %s1046_s16 = smov 64   ;;  %s1047_s18 = smov 4  }
  0x33   : > { %808 = dma.hbm_to_vmem [thread:$0]  (!%p1149_p2), %s1302_s1, 3072, %s144_s28, [#allocation7], %s1046_s16, %s1046_s16, %s1047_s18  }
  0x34   : > { %p688_p3 = scmp.ge.s32.totalorder %s1043_s14, 3 }
  0x35   : > { %p1315_p7 = scmp.ne.s32.totalorder (!%p688_p3), %s1308_s19, 0 }
  0x36   : > { %153 = sbr.rel (%p688_p3) target bundleno = 97 (0x61), region = 20 }
  0x3d   : > { %156 = sbr.rel (!%p1315_p7) target bundleno = 97 (0x61), region = 24  ;;  %s157_s30 = sand.u32 (%p1315_p7), 1, %s1031_s11  }
  0x3e   : > { %s689_s3 = sshll.u32 (%p1315_p7), %s1039_s13, 1  ;;  %s796_s4 = smul.u32 (%p1315_p7), 24, %s157_s30 }
  0x3f   : > { %s164_s5 = ssub.s32 (%p1315_p7), 5, %s689_s3  ;;  %s1177_s7 = scalar_lea.sflag (%p1315_p7), [#allocation4], %s157_s30 }
  0x40   : > { %p165_p4 = scmp.lt.s32.totalorder (%p1315_p7), %s164_s5, 2  ;;  %s161_s28 = scalar_lea.vmem (%p1315_p7), [#allocation3], %s796_s4 }
  0x44   : > { %s1329_s5 = smov (!%p165_p4, %s164_s5), 2 }
  0x45   : > { %s1174_s6 = smul.u32 192, %s1329_s5 }
  0x47   : > { %s170_s29 = ssub.s32 384, %s1174_s6 }
  0x48   : > { %171 = vsyncadd %s1177_s7, %s170_s29  ;;  %p692_p5 = scmp.ne.s32.totalorder %s1174_s6, 0  ;;  %s797_s19 = smul.u32 384, %s1039_s13 }
  0x49   : > { %s178_s8 = sshll.u32 %s161_s28, 4  ;;  %s933_s3 = scalar_lea.hbm %s1301_s0, 960  ;;  %s1187_s8 = int_to_ptr.vmem [resolvable:$true] %s178_s8 }
  0x4a   : > { %s1185_s18 = scalar_lea.hbm %s1301_s0, %s797_s19 }
  0x4b   : > { %s929_s21 = scalar_lea.hbm %s1185_s18, %s1174_s6  ;;  %p934_p0 = scmp.lt.u32.totalorder %s1185_s18, %s1301_s0 }
  0x4c   : > { %p930_p8 = scmp.ne.s32.totalorder %s1185_s18, %s929_s21  ;;  %p935_p2 = scmp.lt.u32.totalorder %s933_s3, %s929_s21 }
  0x4d   : > { %p937_p10 = scmp.lt.u32.totalorder %s929_s21, %s1185_s18 }
  0x4e   : > { %p931_p9 = pnand %p930_p8, %p692_p5  ;;  %p936_p6 = por %p935_p2, %p934_p0 }
  0x50   : > { %p932_p11 = pneg %p931_p9  ;;  %p938_p12 = por %p937_p10, %p936_p6 }
  0x52   : > { %p939_p13 = pnand %p938_p12, %p932_p11 }
  0x54   : > { %942 = shalt.err (!%p939_p13)
}
  0x55   : > { %s943_s29 = scalar_lea.vmem %s1187_s8, %s1174_s6  ;;  %s1048_s28 = smov [#allocation3]  }
  0x56   : > { %p944_p1 = scmp.ne.s32.totalorder %s1187_s8, %s943_s29  ;;  %s947_s19 = sshll.u32 %s1048_s28, 4  ;;  %s948_s19 = int_to_ptr.vmem [resolvable:$false] %s947_s19 }
  0x57   : > { %s949_s15 = scalar_lea.vmem %s948_s19, 768  ;;  %p950_p4 = scmp.lt.s32.totalorder %s1187_s8, %s948_s19 }
  0x58   : > { %p945_p3 = pnand %p944_p1, %p692_p5  ;;  %p951_p8 = scmp.lt.s32.totalorder %s949_s15, %s943_s29 }
  0x5a   : > { %p946_p7 = pneg %p945_p3  ;;  %p952_p9 = por %p951_p8, %p950_p4 }
  0x5c   : > { %p953_p0 = pnand %p952_p9, %p946_p7 }
  0x5e   : > { %956 = shalt.err (!%p953_p0)
}
  0x5f   : > { %s1049_s16 = smov 192   ;;  %s1050_s21 = smov 12  }
  0x60   : > { %184 = dma.hbm_to_vmem [thread:$0]  (%p692_p5), %s1185_s18, %s1174_s6, %s1187_s8, %s1177_s7, %s1049_s16, %s1049_s16, %s1050_s21  }
  0x61 PF: > { %p1316_p11 = scmp.ne.s32.totalorder %s1313_s26, 0 }
  0x62   : > { %s1217_s27 = sand.u32 (!%p1316_p11), 1, %s1027_s10   ;;  %p1317_p2 = scmp.ne.s32.totalorder (!%p1316_p11), %s1310_s22, 0 }
  0x63   : > { %190 = sbr.rel (%p1316_p11) target bundleno = 398 (0x18e), region = 28  ;;  %s193_s3 = scalar_lea.sflag (!%p1316_p11), [#allocation4], %s1217_s27 }
  0x64   : > { %s798_s30 = smul.u32 (!%p1316_p11), 24, %s1217_s27 }
  0x66   : > { %s1221_s4 = scalar_lea.vmem (!%p1316_p11), [#allocation3], %s798_s30 }
  0x6a   : > { %1010 = dma.done.wait (%p1317_p2), %s193_s3, 384  }
  0x6b   : > { %1012 = vsyncadd (%p1317_p2), %s193_s3, 4294966912  ;;  %p1318_p5 = scmp.ne.s32.totalorder %s1309_s20, 0 }
  0x6d   : > { %1014 = dma.done.wait (%p1318_p5), [#allocation7], 3072  }
  0x6e   : > { %1016 = vsyncadd (%p1318_p5), [#allocation7], 4294964224  ;;  %v1051_v0 = vmov 0.0   ;;  %vm1052_vm0 = vmmov 0   ;;  %v873_v1 = vld [vmem:[#allocation6 + $0x40] sm:$0xff]   ;;  %v876_v4 = vld [vmem:[#allocation6 + $0x48] sm:$0xff]  }
  0x6f   : > { %776 = vmatprep.subr.bf16.mxu1 %v1051_v0  ;;  %792 = vmatprep.mubr.msk.bf16.mxu1 %vm1052_vm0, %v1051_v0  ;;  %v874_v2 = vld [vmem:[#allocation6] sm:$0xff]   ;;  %v877_v5 = vld [vmem:[#allocation6 + $0x8] sm:$0xff]   ;;  %v879_v7 = vld [vmem:[#allocation6 + $0x50] sm:$0xff]   ;;  %s698_s20 = sshll.u32 %s1217_s27, 3  ;;  %s561_s26 = scalar_lea.sflag [#allocation5], %s1217_s27 }
  0x70   : > { %745 = vmatprep.subr.bf16.mxu0 %v873_v1  ;;  %v875_v3 = vld [vmem:[#allocation6 + $0x80] sm:$0xff]   ;;  %v878_v6 = vld [vmem:[#allocation6 + $0x88] sm:$0xff]   ;;  %v880_v8 = vld [vmem:[#allocation6 + $0x10] sm:$0xff]   ;;  %s220_s22 = scalar_lea.vmem [#allocation8], %s698_s20  ;;  %p1319_p6 = scmp.ne.s32.totalorder %s1311_s23, 0 }
  0x71   : > { %746 = vmatpush3.bf16.msra.mxu0 %v874_v2  ;;  %777 = vmatpush3.bf16.msra.mxu1 %v875_v3  ;;  %v881_v9 = vld [vmem:[#allocation6 + $0x90] sm:$0xff]   ;;  %v882_v10 = vld [vmem:[#allocation6 + $0x58] sm:$0xff]   ;;  %v885_v13 = vld [vmem:[#allocation6 + $0x60] sm:$0xff]   ;;  %s729_s6 = sshll.u32 (%p1319_p6), %s1035_s12, 1 }
  0x72   : > { %747 = vmatprep.subr.bf16.mxu0 %v876_v4  ;;  %778 = vmatprep.subr.bf16.mxu1 %v1051_v0  ;;  %v883_v11 = vld [vmem:[#allocation6 + $0x18] sm:$0xff]   ;;  %v886_v14 = vld [vmem:[#allocation6 + $0x20] sm:$0xff]   ;;  %v888_v16 = vld [vmem:[#allocation6 + $0x68] sm:$0xff]   ;;  %s569_s7 = ssub.s32 (%p1319_p6), 5, %s729_s6 }
  0x73   : > { %v884_v12 = vld [vmem:[#allocation6 + $0x98] sm:$0xff]   ;;  %v887_v15 = vld [vmem:[#allocation6 + $0xa0] sm:$0xff]   ;;  %v889_v17 = vld [vmem:[#allocation6 + $0x28] sm:$0xff]   ;;  %p570_p10 = scmp.lt.s32.totalorder (%p1319_p6), %s569_s7, 2 }
  0x74   : > { %v890_v18 = vld [vmem:[#allocation6 + $0xa8] sm:$0xff]   ;;  %v891_v19 = vld [vmem:[#allocation6 + $0x70] sm:$0xff]   ;;  %v894_v22 = vld [vmem:[#allocation6 + $0x78] sm:$0xff]  }
  0x75   : > { %748 = vmatpush3.bf16.msra.mxu0 %v877_v5  ;;  %779 = vmatpush3.bf16.msra.mxu1 %v878_v6  ;;  %v892_v20 = vld [vmem:[#allocation6 + $0x30] sm:$0xff]   ;;  %v895_v24 = vld [vmem:[#allocation6 + $0x38] sm:$0xff]  }
  0x76   : > { %749 = vmatprep.subr.bf16.mxu0 %v879_v7  ;;  %780 = vmatprep.subr.bf16.mxu1 %v1051_v0  ;;  %v893_v21 = vld [vmem:[#allocation6 + $0xb0] sm:$0xff]   ;;  %v896_v25 = vld [vmem:[#allocation6 + $0xb8] sm:$0xff]  }
  0x77   : > { %v899_v23 = vld [vmem:[%s1221_s4 + $0x4] ss:$12 sps:$4 sm:$0xff]   ;;  %v897_v26 = vld [vmem:[%s1221_s4] ss:$12 sps:$4 sm:$0xff]   ;;  %v900_v27 = vld [vmem:[%s1221_s4 + $0x8] ss:$12 sps:$4 sm:$0xff]  }
  0x78   : > { %487 = vmatprep.mubr.bf16.mxu0 %v899_v23 }
  0x79   : > { %750 = vmatpush3.bf16.msra.mxu0 %v880_v8  ;;  %781 = vmatpush3.bf16.msra.mxu1 %v881_v9 }
  0x7a   : > { %751 = vmatprep.subr.bf16.mxu0 %v882_v10  ;;  %782 = vmatprep.subr.bf16.mxu1 %v1051_v0 }
  0x7d   : > { %752 = vmatpush3.bf16.msra.mxu0 %v883_v11  ;;  %783 = vmatpush3.bf16.msra.mxu1 %v884_v12 }
  0x7e   : > { %753 = vmatprep.subr.bf16.mxu0 %v885_v13  ;;  %784 = vmatprep.subr.bf16.mxu1 %v1051_v0 }
  0x81   : > { %754 = vmatpush3.bf16.msra.mxu0 %v886_v14  ;;  %785 = vmatpush3.bf16.msra.mxu1 %v887_v15 }
  0x82   : > { %755 = vmatprep.subr.bf16.mxu0 %v888_v16  ;;  %786 = vmatprep.subr.bf16.mxu1 %v1051_v0 }
  0x85   : > { %756 = vmatpush3.bf16.msra.mxu0 %v889_v17  ;;  %787 = vmatpush3.bf16.msra.mxu1 %v890_v18 }
  0x86   : > { %757 = vmatprep.subr.bf16.mxu0 %v891_v19  ;;  %788 = vmatprep.subr.bf16.mxu1 %v1051_v0 }
  0x89   : > { %758 = vmatpush3.bf16.msra.mxu0 %v892_v20  ;;  %789 = vmatpush3.bf16.msra.mxu1 %v893_v21 }
  0x8a   : > { %759 = vmatprep.subr.bf16.mxu0 %v894_v22  ;;  %790 = vmatprep.subr.bf16.mxu1 %v1051_v0 }
  0x8d   : > { %760 = vmatpush3.bf16.msra.mxu0 %v895_v24  ;;  %791 = vmatpush3.bf16.msra.mxu1 %v896_v25 }
  0x90   : > { %488 = vmatmul.mubr.bf16.vlgmr.msra.gmra.mrb[0].mxu0 %v897_v26  ;;  %793 = vmatmul.mubr.bf16.vlgmr.msra.gmra.mrb[0].mxu1 %v900_v27 }
 0x163   : > { %v761_v28 = vpop.f32.mrb[0].mxu0  ;;  %v530_v29 = vpop.f32.mrb[0].mxu1 }
 0x164   : > { %v762_v30 = vpop.f32.mrb[1].mxu0  ;;  %v794_v32 = vpop.f32.mrb[1].mxu1 }
 0x165   : > { %v763_v31 = vadd.f32 %v762_v30, %v761_v28  ;;  %v764_v33 = vpop.f32.mrb[2].mxu0  ;;  %v533_v34 = vpop.f32.mrb[2].mxu1 }
 0x166   : > { %v765_v35 = vpop.f32.mrb[3].mxu0  ;;  %v795_v38 = vpop.f32.mrb[3].mxu1 }
 0x167   : > { %v531_v36 = vadd.f32 %v763_v31, %v530_v29  ;;  %v766_v37 = vadd.f32 %v765_v35, %v764_v33 }
 0x169   : > { %v546_v39 = vmul.f32 0.1, %v531_v36  ;;  %v534_v40 = vadd.f32 %v766_v37, %v533_v34 }
 0x16b   : > { %v547_v41 = vmul.f32 0.1, %v534_v40  ;;  %v548_v42 = vmax.f32 %v531_v36, %v546_v39  ;;  %567 = sbr.rel (!%p1319_p6) target bundleno = 398 (0x18e), region = 48 }
 0x16d   : > { %v549_v43 = vmax.f32 %v534_v40, %v547_v41 }
 0x16f   : > { %v743_v44 = vpack.c.bf16 %v549_v43, %v548_v42 }
 0x171   : > { %744 = vst [vmem:[%s220_s22] sm:$0xff] %v743_v44  }
 0x172   : > { %s1331_s7 = smov (!%p570_p10, %s569_s7), 2 }
 0x173   : > { %s1239_s8 = sshll.u32 %s1331_s7, 6 }
 0x174   : > { %s574_s18 = ssub.s32 128, %s1239_s8 }
 0x175   : > { %575 = vsyncadd %s561_s26, %s574_s18  ;;  %p731_p12 = scmp.ne.s32.totalorder %s1239_s8, 0  ;;  %s739_s5 = sshll.u32 %s1035_s12, 7 }
 0x176   : > { %s1249_s28 = scalar_lea.hbm %s1303_s2, %s739_s5  ;;  %s581_s19 = sshll.u32 %s220_s22, 4  ;;  %s1251_s19 = int_to_ptr.vmem [resolvable:$true] %s581_s19 }
 0x177   : > { %s957_s15 = scalar_lea.vmem %s1251_s19, %s1239_s8  ;;  %s1053_s16 = smov [#allocation8]  }
 0x178   : > { %p958_p13 = scmp.ne.s32.totalorder %s1251_s19, %s957_s15  ;;  %s961_s21 = sshll.u32 %s1053_s16, 4  ;;  %s962_s21 = int_to_ptr.vmem [resolvable:$false] %s961_s21 }
 0x179   : > { %s963_s12 = scalar_lea.vmem %s962_s21, 256  ;;  %p964_p7 = scmp.lt.s32.totalorder %s1251_s19, %s962_s21 }
 0x17a   : > { %p959_p1 = pnand %p958_p13, %p731_p12  ;;  %p965_p4 = scmp.lt.s32.totalorder %s963_s12, %s957_s15 }
 0x17c   : > { %p960_p3 = pneg %p959_p1  ;;  %p966_p8 = por %p965_p4, %p964_p7 }
 0x17e   : > { %p967_p9 = pnand %p966_p8, %p960_p3 }
 0x180   : > { %970 = shalt.err (!%p967_p9)
}
 0x181   : > { %s971_s30 = scalar_lea.hbm %s1249_s28, %s1239_s8  ;;  %s975_s20 = scalar_lea.hbm %s1303_s2, 320 }
 0x182   : > { %p972_p0 = scmp.ne.s32.totalorder %s1249_s28, %s971_s30  ;;  %p976_p5 = scmp.lt.u32.totalorder %s1249_s28, %s1303_s2 }
 0x183   : > { %p977_p6 = scmp.lt.u32.totalorder %s975_s20, %s971_s30  ;;  %p979_p13 = scmp.lt.u32.totalorder %s971_s30, %s1249_s28 }
 0x184   : > { %p973_p11 = pnand %p972_p0, %p731_p12 }
 0x185   : > { %p978_p10 = por %p977_p6, %p976_p5 }
 0x186   : > { %p974_p2 = pneg %p973_p11 }
 0x187   : > { %p980_p1 = por %p979_p13, %p978_p10 }
 0x189   : > { %p981_p3 = pnand %p980_p1, %p974_p2 }
 0x18b   : > { %984 = shalt.err (!%p981_p3)
}
 0x18c   : > { %s1054_s7 = smov 64   ;;  %s1055_s18 = smov 4  }
 0x18d   : > { %587 = dma.vmem_to_hbm [thread:$0]  (%p731_p12), %s1251_s19, %s1239_s8, %s1249_s28, %s561_s26, %s1054_s7, %s1054_s7, %s1055_s18  }
 0x18e PF: > { %p815_p7 = scmp.ge.s32.totalorder %s1043_s14, 2  ;;  %s596_s5 = sand.u32 1, %s1023_s9  }
 0x18f   : > { %p1320_p4 = scmp.ne.s32.totalorder %s1312_s25, 0  ;;  %s597_s23 = scalar_lea.sflag [#allocation5], %s596_s5 }
 0x191   : > { %p810_p8 = pnand %p815_p7, %p1320_p4 }
 0x193   : > { %1018 = dma.done.wait (!%p810_p8), %s597_s23, 128  }
 0x194   : > { %1020 = vsyncadd (!%p810_p8), %s597_s23, 4294967168  ;;  %s19_s14 = sadd.s32 1, %s1043_s14   ;;  %s1321_s9 = smov %s1027_s10 }
 0x195   : > { %p16_p9 = scmp.ge.s32.totalorder %s19_s14, 5   ;;  %s1322_s10 = smov %s1031_s11 }
 0x196   : > { %s1323_s11 = smov %s1133_s24  ;;  %s1324_s12 = smov %s1039_s13 }
 0x197   : > { %s1325_s13 = smov %s1327_s17  ;;  %18 = sbr.rel (!%p16_p9) target bundleno = 7 (0x7), region = 86 }
 0x19e   :  { %602 = vsyncpa [#allocation4], 1 }
 0x19f   :  { %604 = vsyncpa [#allocation4 + $0x1], 1 }
 0x1a0   :  { %605 = vsyncpa [#allocation7], 1 }
 0x1a1   :  { %606 = vsyncpa [#allocation5], 1 }
 0x1a2   :  { %608 = vsyncpa [#allocation5 + $0x1], 1 }

</bundles_post_ra>
